<compile_context>
chip_gen: v5e
topology: v5e:2x2
jax: 0.10.0
libtpu: 0.0.40
codegen_flags: <defaults>
</compile_context>

<pallas_src>
import jax
import jax.numpy as jnp
from jax import lax
from jax.experimental import pallas as pl
from jax.experimental.pallas import tpu as pltpu

NEG_INF = float("-inf")


def attention_general_kernel(hid_ref, enc_ref, w_ref, b_ref, len_ref,
                             ctx_ref, attn_ref, q_scr, score_scr):
    Bb = hid_ref.shape[0]
    T_e = enc_ref.shape[1]

    hid = hid_ref[...]                      # (Bb, H)
    w = w_ref[...]                          # (H, H)  PyTorch Linear weight (out, in)
    bias = b_ref[...]                       # (1, H)

    # Reassociated 'general' score: q = hid @ W (one MXU matmul for the block),
    # plus the per-batch bias contribution hb = hid . bias.
    q_scr[...] = jnp.dot(hid, w, preferred_element_type=jnp.float32)    # (Bb, H)
    hb = jnp.sum((hid * bias).astype(jnp.float32), axis=-1, keepdims=True)  # (Bb, 1)

    # score[b, :] = q[b] @ enc[b].T  (transposed contraction handled by the MXU
    # data path via dot_general -- no materialized transpose).
    def score_body(i, carry):
        enc_i = enc_ref[i]                  # (T_e, H)
        q_i = q_scr[pl.ds(i, 1), :]         # (1, H)
        score_scr[pl.ds(i, 1), :] = lax.dot_general(
            q_i, enc_i,
            dimension_numbers=(((1,), (1,)), ((), ())),
            preferred_element_type=jnp.float32)          # (1, T_e)
        return carry

    lax.fori_loop(0, Bb, score_body, 0, unroll=Bb <= 16)

    score = score_scr[...] + hb             # (Bb, T_e), f32

    # masked_fill(position >= enc_lengths[b], -inf).
    # Note: a zero-length row yields NaNs after softmax, same as the PyTorch ref.
    lens = len_ref[...]                     # (Bb, 1) int32
    pos = lax.broadcasted_iota(jnp.int32, (Bb, T_e), 1)
    score = jnp.where(pos < lens, score, NEG_INF)

    # softmax over T_e (kept in f32 on the VPU/EUP).
    m = jnp.max(score, axis=-1, keepdims=True)
    e = jnp.exp(score - m)
    s = jnp.sum(e, axis=-1, keepdims=True)
    attn = e * pl.reciprocal(s, approx=False)            # (Bb, T_e)
    attn_ref[...] = attn.astype(attn_ref.dtype)          # lane-dense block store

    # contexts: ctx[b] = attn[b] @ enc[b]
    def ctx_body(i, carry):
        enc_i = enc_ref[i]                  # (T_e, H)
        attn_i = attn_ref[pl.ds(i, 1), :]   # (1, T_e)
        ctx_ref[pl.ds(i, 1), :] = jnp.dot(
            attn_i.astype(jnp.float32), enc_i.astype(jnp.float32),
            preferred_element_type=jnp.float32).astype(ctx_ref.dtype)
        return carry

    lax.fori_loop(0, Bb, ctx_body, 0, unroll=Bb <= 16)


def _pick_block_batch(B, T_e, H, itemsize=4, budget_bytes=8 * 1024 * 1024):
    """Largest batch-block that (a) divides B, (b) keeps double-buffered tiles
    within a conservative VMEM budget, and (c) satisfies the (8,128) block rule
    (block == full dim, or a multiple of 8)."""
    per_b = 2 * T_e * H * itemsize + 2 * (2 * H + 2 * T_e + 1) * itemsize
    cap = max(1, budget_bytes // max(per_b, 1))
    if B <= cap:
        return B
    best = None
    bb = 8
    while bb <= cap:
        if B % bb == 0:
            best = bb
        bb += 8
    return best if best is not None else B


def attention_general(hiddens, enc_outputs, weight, bias, enc_lengths):
    """Pallas implementation of Attention(method='general').forward(...,
    return_weight=True). Returns (contexts, attns)."""
    B, T_d, H = hiddens.shape
    _, T_e, _ = enc_outputs.shape
    assert T_d == 1, "decoder query length must be 1 (as in the PyTorch module)"

    hid2 = hiddens.reshape(B, H)                         # free reshape (T_d == 1)
    bias2 = bias.reshape(1, H)
    lens2 = jnp.asarray(enc_lengths, dtype=jnp.int32).reshape(B, 1)

    Bb = _pick_block_batch(B, T_e, H, itemsize=hiddens.dtype.itemsize)
    grid = (B // Bb,)

    ctx2, attn2 = pl.pallas_call(
        attention_general_kernel,
        out_shape=(
            jax.ShapeDtypeStruct((B, H), hiddens.dtype),
            jax.ShapeDtypeStruct((B, T_e), hiddens.dtype),
        ),
        grid=grid,
        in_specs=[
            pl.BlockSpec((Bb, H), lambda i: (i, 0)),          # hiddens (2-D)
            pl.BlockSpec((Bb, T_e, H), lambda i: (i, 0, 0)),  # enc_outputs
            pl.BlockSpec((H, H), lambda i: (0, 0)),           # weight (resident)
            pl.BlockSpec((1, H), lambda i: (0, 0)),           # bias   (resident)
            pl.BlockSpec((Bb, 1), lambda i: (i, 0)),          # enc_lengths
        ],
        out_specs=(
            pl.BlockSpec((Bb, H), lambda i: (i, 0)),          # contexts
            pl.BlockSpec((Bb, T_e), lambda i: (i, 0)),        # attns
        ),
        scratch_shapes=[
            pltpu.VMEM((Bb, H), jnp.float32),                 # q = hid @ W
            pltpu.VMEM((Bb, T_e), jnp.float32),               # raw scores
        ],
        compiler_params=pltpu.CompilerParams(
            dimension_semantics=("parallel",),                # megacore on v7x
            vmem_limit_bytes=32 * 1024 * 1024,
        ),
    )(hid2, enc_outputs, weight, bias2, lens2)

    return ctx2.reshape(B, T_d, H), attn2.reshape(B, T_d, T_e)


def attention_general_ref(hiddens, enc_outputs, weight, bias, enc_lengths):
    """Pure-JAX reference mirroring the PyTorch forward (un-reassociated math)."""
    B, T_d, H = hiddens.shape
    T_e = enc_outputs.shape[1]
    proj = jnp.einsum("bth,oh->bto", enc_outputs, weight) + bias          # (B,T_e,H)
    score = jnp.einsum("bdh,bth->bdt", hiddens, proj)                     # (B,1,T_e)
    pos = jnp.arange(T_e)[None, None, :]
    mask = pos >= enc_lengths[:, None, None]
    score = jnp.where(mask, NEG_INF, score)
    attn = jax.nn.softmax(score, axis=2)
    ctx = jnp.einsum("bdt,bth->bdh", attn, enc_outputs)
    return ctx, attn


if __name__ == "__main__":
    B, T_d, T_e, H = 2, 1, 8, 32

    key = jax.random.PRNGKey(0)
    k1, k2, k3, k4 = jax.random.split(key, 4)

    hiddens = jax.random.normal(k1, (B, T_d, H), dtype=jnp.float32)
    enc_outputs = jax.random.normal(k2, (B, T_e, H), dtype=jnp.float32)
    # Deterministic parameter init for nn.Linear(hidden_size, hidden_size)
    weight = (jax.random.uniform(k3, (H, H), dtype=jnp.float32) - 0.5) * (2.0 / jnp.sqrt(H))
    bias = (jax.random.uniform(k4, (H,), dtype=jnp.float32) - 0.5) * (2.0 / jnp.sqrt(H))
    enc_lengths = jnp.array([5, 8], dtype=jnp.int32)   # PyTorch uses a python list

    ctx, attn = attention_general(hiddens, enc_outputs, weight, bias, enc_lengths)
    jax.block_until_ready((ctx, attn))

    ctx_ref, attn_ref = attention_general_ref(hiddens, enc_outputs, weight, bias,
                                              enc_lengths)
    assert ctx.shape == (B, T_d, H) and attn.shape == (B, T_d, T_e)
    assert jnp.allclose(ctx, ctx_ref, atol=1e-5, rtol=1e-5)
    assert jnp.allclose(attn, attn_ref, atol=1e-5, rtol=1e-5)

    print("KERNEL_OK")
</pallas_src>

<mosaic_0001>
module attributes {stable_mosaic.version = 11 : i64} {
  func.func @attention_general_kernel(%arg0: i32, %arg1: memref<2x32xf32, #tpu.memory_space<vmem>>, %arg2: memref<2x8x32xf32, #tpu.memory_space<vmem>>, %arg3: memref<32x32xf32, #tpu.memory_space<vmem>>, %arg4: memref<1x32xf32, #tpu.memory_space<vmem>>, %arg5: memref<2x1xi32, #tpu.memory_space<vmem>>, %arg6: memref<2x32xf32, #tpu.memory_space<vmem>>, %arg7: memref<2x8xf32, #tpu.memory_space<vmem>>, %arg8: memref<2x32xf32, #tpu.memory_space<vmem>>, %arg9: memref<2x8xf32, #tpu.memory_space<vmem>>) attributes {dimension_semantics = [#tpu.dimension_semantics<parallel>], iteration_bounds = array<i64: 1>, scalar_prefetch = 0 : i64, scratch_operands = 2 : i64, tpu.core_type = #tpu.core_type<tc>, window_params = [{transform_indices = @transform_0, window_bounds = array<i64: 2, 32>}, {transform_indices = @transform_1, window_bounds = array<i64: 2, 8, 32>}, {pipeline_mode = #tpu.pipeline_mode<synchronous>, transform_indices = @transform_2, window_bounds = array<i64: 32, 32>}, {pipeline_mode = #tpu.pipeline_mode<synchronous>, transform_indices = @transform_3, window_bounds = array<i64: 1, 32>}, {transform_indices = @transform_4, window_bounds = array<i64: 2, 1>}, {transform_indices = @transform_5, window_bounds = array<i64: 2, 32>}, {transform_indices = @transform_6, window_bounds = array<i64: 2, 8>}]} {
    %c0 = arith.constant 0 : index
    %c0_0 = arith.constant 0 : index
    %0 = vector.load %arg1[%c0, %c0_0] : memref<2x32xf32, #tpu.memory_space<vmem>>, vector<2x32xf32>
    %c0_1 = arith.constant 0 : index
    %c0_2 = arith.constant 0 : index
    %1 = vector.load %arg3[%c0_1, %c0_2] : memref<32x32xf32, #tpu.memory_space<vmem>>, vector<32x32xf32>
    %c0_3 = arith.constant 0 : index
    %c0_4 = arith.constant 0 : index
    %2 = vector.load %arg4[%c0_3, %c0_4] : memref<1x32xf32, #tpu.memory_space<vmem>>, vector<1x32xf32>
    %cst = arith.constant dense<0.000000e+00> : vector<2x32xf32>
    %3 = tpu.matmul %0, %1, %cst {dimension_numbers = #tpu.dot_dimension_numbers<[1], [0], [0], [1], [0, 0, 1, 1], [], []>} : vector<2x32xf32>, vector<32x32xf32>, vector<2x32xf32> -> vector<2x32xf32>
    %c0_5 = arith.constant 0 : index
    %c0_6 = arith.constant 0 : index
    %4 = vector.load %arg8[%c0_5, %c0_6] : memref<2x32xf32, #tpu.memory_space<vmem>>, vector<2x32xf32>
    tpu.vector_store %arg8[%c0_5, %c0_6], %3 {strides = array<i32>} : memref<2x32xf32, #tpu.memory_space<vmem>>, vector<2x32xf32>,
    %5 = vector.broadcast %2 : vector<1x32xf32> to vector<2x32xf32>
    %6 = arith.mulf %0, %5 : vector<2x32xf32>
    %cst_7 = arith.constant dense<0.000000e+00> : vector<2xf32>
    %7 = vector.multi_reduction <add>, %6, %cst_7 [1] : vector<2x32xf32> to vector<2xf32>
    %8 = vector.shape_cast %7 : vector<2xf32> to vector<2x1xf32>
    %c0_i32 = arith.constant 0 : i32
    %9 = arith.index_cast %c0_i32 : i32 to index
    %c0_8 = arith.constant 0 : index
    %c0_9 = arith.constant 0 : index
    %10 = vector.load %arg2[%9, %c0_8, %c0_9] : memref<2x8x32xf32, #tpu.memory_space<vmem>>, vector<1x8x32xf32>
    %11 = vector.shape_cast %10 : vector<1x8x32xf32> to vector<8x32xf32>
    %12 = arith.index_cast %c0_i32 : i32 to index
    %c0_10 = arith.constant 0 : index
    %13 = vector.load %arg8[%12, %c0_10] : memref<2x32xf32, #tpu.memory_space<vmem>>, vector<1x32xf32>
    %cst_11 = arith.constant dense<0.000000e+00> : vector<1x8xf32>
    %14 = tpu.matmul %13, %11, %cst_11 {dimension_numbers = #tpu.dot_dimension_numbers<[1], [1], [0], [0], [0, 0, 1, 0], [], []>} : vector<1x32xf32>, vector<8x32xf32>, vector<1x8xf32> -> vector<1x8xf32>
    %15 = arith.index_cast %c0_i32 : i32 to index
    %c0_12 = arith.constant 0 : index
    %16 = vector.load %arg9[%15, %c0_12] : memref<2x8xf32, #tpu.memory_space<vmem>>, vector<1x8xf32>
    tpu.vector_store %arg9[%15, %c0_12], %14 {strides = array<i32>} : memref<2x8xf32, #tpu.memory_space<vmem>>, vector<1x8xf32>,
    %c1_i32 = arith.constant 1 : i32
    %17 = arith.index_cast %c1_i32 : i32 to index
    %c0_13 = arith.constant 0 : index
    %c0_14 = arith.constant 0 : index
    %18 = vector.load %arg2[%17, %c0_13, %c0_14] : memref<2x8x32xf32, #tpu.memory_space<vmem>>, vector<1x8x32xf32>
    %19 = vector.shape_cast %18 : vector<1x8x32xf32> to vector<8x32xf32>
    %20 = arith.index_cast %c1_i32 : i32 to index
    %c0_15 = arith.constant 0 : index
    %21 = vector.load %arg8[%20, %c0_15] : memref<2x32xf32, #tpu.memory_space<vmem>>, vector<1x32xf32>
    %cst_16 = arith.constant dense<0.000000e+00> : vector<1x8xf32>
    %22 = tpu.matmul %21, %19, %cst_16 {dimension_numbers = #tpu.dot_dimension_numbers<[1], [1], [0], [0], [0, 0, 1, 0], [], []>} : vector<1x32xf32>, vector<8x32xf32>, vector<1x8xf32> -> vector<1x8xf32>
    %23 = arith.index_cast %c1_i32 : i32 to index
    %c0_17 = arith.constant 0 : index
    %24 = vector.load %arg9[%23, %c0_17] : memref<2x8xf32, #tpu.memory_space<vmem>>, vector<1x8xf32>
    tpu.vector_store %arg9[%23, %c0_17], %22 {strides = array<i32>} : memref<2x8xf32, #tpu.memory_space<vmem>>, vector<1x8xf32>,
    %c2_i32 = arith.constant 2 : i32
    %c0_18 = arith.constant 0 : index
    %c0_19 = arith.constant 0 : index
    %25 = vector.load %arg9[%c0_18, %c0_19] : memref<2x8xf32, #tpu.memory_space<vmem>>, vector<2x8xf32>
    %26 = vector.broadcast %8 : vector<2x1xf32> to vector<2x8xf32>
    %27 = arith.addf %25, %26 : vector<2x8xf32>
    %c0_20 = arith.constant 0 : index
    %c0_21 = arith.constant 0 : index
    %28 = vector.load %arg5[%c0_20, %c0_21] : memref<2x1xi32, #tpu.memory_space<vmem>>, vector<2x1xi32>
    %29 = tpu.iota {dimensions = array<i32: 1>} : vector<2x8xi32>
    %30 = vector.broadcast %28 : vector<2x1xi32> to vector<2x8xi32>
    %31 = arith.cmpi slt, %29, %30 : vector<2x8xi32>
    %cst_22 = arith.constant 0xFF800000 : f32
    %32 = vector.broadcast %cst_22 : f32 to vector<2x8xf32>
    %33 = arith.select %31, %27, %32 : vector<2x8xi1>, vector<2x8xf32>
    %cst_23 = arith.constant dense<0xFF800000> : vector<2xf32>
    %34 = vector.multi_reduction <maximumf>, %33, %cst_23 [1] : vector<2x8xf32> to vector<2xf32>
    %35 = vector.shape_cast %34 : vector<2xf32> to vector<2x1xf32>
    %36 = vector.broadcast %35 : vector<2x1xf32> to vector<2x8xf32>
    %37 = arith.subf %33, %36 : vector<2x8xf32>
    %38 = math.exp %37 : vector<2x8xf32>
    %cst_24 = arith.constant dense<0.000000e+00> : vector<2xf32>
    %39 = vector.multi_reduction <add>, %38, %cst_24 [1] : vector<2x8xf32> to vector<2xf32>
    %40 = vector.shape_cast %39 : vector<2xf32> to vector<2x1xf32>
    %41 = tpu.reciprocal %40 : vector<2x1xf32> -> vector<2x1xf32>
    %42 = vector.broadcast %41 : vector<2x1xf32> to vector<2x8xf32>
    %43 = arith.mulf %38, %42 : vector<2x8xf32>
    %c0_25 = arith.constant 0 : index
    %c0_26 = arith.constant 0 : index
    %44 = vector.load %arg7[%c0_25, %c0_26] : memref<2x8xf32, #tpu.memory_space<vmem>>, vector<2x8xf32>
    tpu.vector_store %arg7[%c0_25, %c0_26], %43 {strides = array<i32>} : memref<2x8xf32, #tpu.memory_space<vmem>>, vector<2x8xf32>,
    %c0_i32_27 = arith.constant 0 : i32
    %45 = arith.index_cast %c0_i32_27 : i32 to index
    %c0_28 = arith.constant 0 : index
    %c0_29 = arith.constant 0 : index
    %46 = vector.load %arg2[%45, %c0_28, %c0_29] : memref<2x8x32xf32, #tpu.memory_space<vmem>>, vector<1x8x32xf32>
    %47 = vector.shape_cast %46 : vector<1x8x32xf32> to vector<8x32xf32>
    %48 = arith.index_cast %c0_i32_27 : i32 to index
    %c0_30 = arith.constant 0 : index
    %49 = vector.load %arg7[%48, %c0_30] : memref<2x8xf32, #tpu.memory_space<vmem>>, vector<1x8xf32>
    %cst_31 = arith.constant dense<0.000000e+00> : vector<1x32xf32>
    %50 = tpu.matmul %49, %47, %cst_31 {dimension_numbers = #tpu.dot_dimension_numbers<[1], [0], [0], [1], [0, 0, 1, 1], [], []>} : vector<1x8xf32>, vector<8x32xf32>, vector<1x32xf32> -> vector<1x32xf32>
    %51 = arith.index_cast %c0_i32_27 : i32 to index
    %c0_32 = arith.constant 0 : index
    %52 = vector.load %arg6[%51, %c0_32] : memref<2x32xf32, #tpu.memory_space<vmem>>, vector<1x32xf32>
    tpu.vector_store %arg6[%51, %c0_32], %50 {strides = array<i32>} : memref<2x32xf32, #tpu.memory_space<vmem>>, vector<1x32xf32>,
    %c1_i32_33 = arith.constant 1 : i32
    %53 = arith.index_cast %c1_i32_33 : i32 to index
    %c0_34 = arith.constant 0 : index
    %c0_35 = arith.constant 0 : index
    %54 = vector.load %arg2[%53, %c0_34, %c0_35] : memref<2x8x32xf32, #tpu.memory_space<vmem>>, vector<1x8x32xf32>
    %55 = vector.shape_cast %54 : vector<1x8x32xf32> to vector<8x32xf32>
    %56 = arith.index_cast %c1_i32_33 : i32 to index
    %c0_36 = arith.constant 0 : index
    %57 = vector.load %arg7[%56, %c0_36] : memref<2x8xf32, #tpu.memory_space<vmem>>, vector<1x8xf32>
    %cst_37 = arith.constant dense<0.000000e+00> : vector<1x32xf32>
    %58 = tpu.matmul %57, %55, %cst_37 {dimension_numbers = #tpu.dot_dimension_numbers<[1], [0], [0], [1], [0, 0, 1, 1], [], []>} : vector<1x8xf32>, vector<8x32xf32>, vector<1x32xf32> -> vector<1x32xf32>
    %59 = arith.index_cast %c1_i32_33 : i32 to index
    %c0_38 = arith.constant 0 : index
    %60 = vector.load %arg6[%59, %c0_38] : memref<2x32xf32, #tpu.memory_space<vmem>>, vector<1x32xf32>
    tpu.vector_store %arg6[%59, %c0_38], %58 {strides = array<i32>} : memref<2x32xf32, #tpu.memory_space<vmem>>, vector<1x32xf32>,
    %c2_i32_39 = arith.constant 2 : i32
    return
  }
  func.func @transform_0(%arg0: i32) -> (i32, i32) {
    %c0_i32 = arith.constant 0 : i32
    %c0_i32_0 = arith.constant 0 : i32
    return %arg0, %c0_i32 : i32, i32
  }
  func.func @transform_1(%arg0: i32) -> (i32, i32, i32) {
    %c0_i32 = arith.constant 0 : i32
    %c0_i32_0 = arith.constant 0 : i32
    %c0_i32_1 = arith.constant 0 : i32
    return %arg0, %c0_i32, %c0_i32_0 : i32, i32, i32
  }
  func.func @transform_2(%arg0: i32) -> (i32, i32) {
    %c0_i32 = arith.constant 0 : i32
    %c0_i32_0 = arith.constant 0 : i32
    %c0_i32_1 = arith.constant 0 : i32
    return %c0_i32, %c0_i32_0 : i32, i32
  }
  func.func @transform_3(%arg0: i32) -> (i32, i32) {
    %c0_i32 = arith.constant 0 : i32
    %c0_i32_0 = arith.constant 0 : i32
    %c0_i32_1 = arith.constant 0 : i32
    return %c0_i32, %c0_i32_0 : i32, i32
  }
  func.func @transform_4(%arg0: i32) -> (i32, i32) {
    %c0_i32 = arith.constant 0 : i32
    %c0_i32_0 = arith.constant 0 : i32
    return %arg0, %c0_i32 : i32, i32
  }
  func.func @transform_5(%arg0: i32) -> (i32, i32) {
    %c0_i32 = arith.constant 0 : i32
    %c0_i32_0 = arith.constant 0 : i32
    return %arg0, %c0_i32 : i32, i32
  }
  func.func @transform_6(%arg0: i32) -> (i32, i32) {
    %c0_i32 = arith.constant 0 : i32
    %c0_i32_0 = arith.constant 0 : i32
    return %arg0, %c0_i32 : i32, i32
  }
}

</mosaic_0001>

<bundles_post_ra>
// kernel: tpu_custom_call.1
= control target key start
LH: loop header
LB: loop body
LE: loop exit
PB: predicated region body
PF: predicated region fallthrough
CT: control target
= control target key end

     0   :  { %12 = vsyncpa [#allocation5], 0  ;;  %s474_s0 = inlined_call_operand.vmem [shape: f32[2,32], index: 0, kind: input, shape index: {}]   ;;  %s475_s1 = inlined_call_operand.hbm [shape: f32[2,8,32], index: 1, kind: input, shape index: {}]   ;;  %s476_s2 = inlined_call_operand.hbm [shape: f32[32,32], index: 2, kind: input, shape index: {}]   ;;  %s477_s3 = inlined_call_operand.vmem [shape: f32[1,32], index: 3, kind: input, shape index: {}]   ;;  %s478_s4 = inlined_call_operand.vmem [shape: s32[2,1], index: 4, kind: input, shape index: {}]   ;;  %s479_s5 = inlined_call_operand.hbm [shape: f32[2,32], index: 5, kind: output, shape index: {0}]   ;;  %s480_s6 = inlined_call_operand.hbm [shape: f32[2,8], index: 6, kind: output, shape index: {1}]  }
   0x1   :  { %13 = vsyncpa [#allocation8], 0 }
   0x2   :  { %14 = vsyncpa [#allocation6], 0 }
   0x3   :  { %15 = vsyncpa [#allocation11], 0  ;;  %s22_s23 = sshll.u32 %s475_s1, 4  ;;  %s403_s24 = smov [#allocation4]   ;;  %s23_s23 = int_to_ptr.hbm [resolvable:$true] %s22_s23 }
   0x4   :  { %s24_s25 = sshll.u32 %s403_s24, 4  ;;  %s35_s28 = sshll.u32 %s476_s2, 4  ;;  %s25_s25 = int_to_ptr.vmem [resolvable:$true] %s24_s25  ;;  %s36_s28 = int_to_ptr.hbm [resolvable:$true] %s35_s28 }
   0x5   :  { %s404_s29 = smov 128   ;;  %s405_s30 = smov 8  }
   0x6   :  { %30 = dma.hbm_to_vmem [thread:$0]  %s23_s23, 256, %s25_s25, [#allocation5], %s404_s29, %s404_s29, %s405_s30  }
   0x7   :  { %s406_s7 = smov [#allocation7]  }
   0x8   :  { %s37_s8 = sshll.u32 %s406_s7, 4  ;;  %s38_s8 = int_to_ptr.vmem [resolvable:$true] %s37_s8 }
   0x9   :  { %43 = dma.hbm_to_vmem [thread:$0]  %s36_s28, 512, %s38_s8, [#allocation8], %s404_s29, %s404_s29, %s405_s30  }
   0xa   :  { %395 = dma.done.wait [#allocation5], 256  }
   0xb   :  { %396 = vsyncadd [#allocation5], 4294967040 }
   0xc   :  { %397 = dma.done.wait [#allocation8], 512  }
   0xd   :  { %398 = vsyncadd [#allocation8], 4294966784  ;;  %v60_v0 = vld [vmem:[#allocation7 + $0x18] sm:$0xff]  ;;  %v59_v1 = vld [vmem:[#allocation7 + $0x10] sm:$0xff]  ;;  %vm62_vm0 = vcmask 261120   ;;  %v407_v8 = vmov 0   ;;  %v158_v18 = vlaneseq }
   0xe   :  { %78 = vmatpush.msra.mxu0 %v60_v0  ;;  %v58_v2 = vld [vmem:[#allocation7 + $0x8] sm:$0xff]  ;;  %v57_v3 = vld [vmem:[#allocation7] sm:$0xff]  ;;  %v95_v5 = vld [vmem:[#allocation4] sm:$0xff]  ;;  %293 = vset.pattern.permute.xlu0 %v407_v8  ;;  %vm86_vm1 = vcmask 254976   ;;  %vm123_vm2 = vcmask 57344   ;;  %vm165_vm4 = vcmask 58368  }
   0xf   :  { %v56_v4 = vld [vmem:[%s474_s0] sm:$0x3]  ;;  %v126_v6 = vld [vmem:[#allocation4 + $0x8] sm:$0xff]  ;;  %280 = vmatpush.xpose.msk.msra.mxu1 %vm62_vm0, %v95_v5  ;;  %212 = vmatpush.msra.mxu3 %v95_v5  ;;  %v159_v19 = vand.u32 127, %v158_v18  ;;  %vm193_vm9 = vcmask 64512   ;;  %s263_s14 = sshll.u32 %s480_s6, 4  ;;  %s264_s14 = int_to_ptr.hbm [resolvable:$true] %s263_s14 }
  0x10   :  { %79 = vmatpush.msra.mxu0 %v59_v1  ;;  %282 = vmatpush.xpose.msk.msra.mxu2 %vm62_vm0, %v126_v6  ;;  %v294_v7 = vld [vmem:[%s477_s3] ss:$0 sm:$0xff]  ;;  %s408_s3 = smov [#allocation10]   ;;  %vm217_vm10 = vcmask 253952   ;;  %s409_s15 = smov [#allocation9]  }
  0x11   :  { %239 = vmatpush.msrb.mxu3 %v126_v6  ;;  %v91_v9 = vmul.f32 %v294_v7, %v56_v4  ;;  %v157_v11 = vld [vmem:[%s478_s4] sm:$0x3]  ;;  %s261_s4 = sshll.u32 %s408_s3, 4  ;;  %s250_s16 = sshll.u32 %s409_s15, 4  ;;  %s262_s4 = int_to_ptr.vmem [resolvable:$true] %s261_s4  ;;  %s251_s16 = int_to_ptr.vmem [resolvable:$true] %s250_s16 }
  0x12   :  { %80 = vmatpush.msra.mxu0 %v58_v2  ;;  %s252_s19 = sshll.u32 %s479_s5, 4  ;;  %s253_s19 = int_to_ptr.hbm [resolvable:$true] %s252_s19 }
  0x13   :  { %v92_v10 = vsel %vm86_vm1, %v91_v9, 0.0 }
  0x14   :  { %81 = vmatpush.msra.mxu0 %v57_v3  ;;  %93 = vadd.xlane.f32.xlu0 %v92_v10 }
  0x15   :  { %279 = vmatmul.msk.f32.vlgmr.msra.gmra.mxu0 %vm62_vm0, %v56_v4 }
  0x28   :  { %161 = vperm.xlu0 %293, %v157_v11  }
  0x87   :  { %v94_v16 = vpop.xlane.xlu0 %93 }
  0x92   :  { %v83_v12 = vpop.f32.mrf.mxu0 }
  0x93   :  { %87 = vst.msk [vmem:[#allocation2] sm:$0x3] %vm86_vm1, %v83_v12 }
  0x9a   :  { %v96_v13 = vld [vmem:[#allocation2] sm:$0x1]  ;;  %v127_v14 = vld [vmem:[#allocation2 + $0x1] sm:$0x1]  ;;  %v162_v20 = vpop.permute.xlu0 %161 }
  0x9b   :  { %281 = vmatmul.msk.f32.vlgmr.msra.gmra.mxu1 %vm62_vm0, %v96_v13  ;;  %283 = vmatmul.msk.f32.vlgmr.msra.gmra.mxu2 %vm62_vm0, %v127_v14  ;;  %vm163_vm3 = vcmp.lt.s32.totalorder %v159_v19, %v162_v20 }
 0x118   :  { %v120_v15 = vpop.f32.mrf.mxu1 }
 0x119   :  { %124 = vst.msk [vmem:[#allocation3] sm:$0x1] %vm123_vm2, %v120_v15 }
 0x11e   :  { %v151_v17 = vpop.f32.mrf.mxu2 }
 0x11f   :  { %154 = vst.msk [vmem:[#allocation3 + $0x1] sm:$0x1] %vm123_vm2, %v151_v17 }
 0x126   :  { %v155_v21 = vld [vmem:[#allocation3] sm:$0x3] }
 0x127   :  { %v156_v22 = vadd.f32 %v155_v21, %v94_v16 }
 0x129   :  { %v164_v23 = vsel %vm163_vm3, %v156_v22, -inf }
 0x12a   :  { %v166_v24 = vsel %vm165_vm4, %v164_v23, -inf }
 0x12b   :  { %167 = vmax.xlane.f32.xlu1 %v166_v24 }
 0x19e   :  { %v168_v25 = vpop.xlane.xlu1 %167 }
 0x19f   :  { %v169_v26 = vsub.f32 %v164_v23, %v168_v25 }
 0x1a1   :  { %v170_v27 = vmul.f32 1.442695, %v169_v26 }
 0x1a3   :  { %295 = vpow2.f32 %v170_v27 }
 0x1a9   :  { %v296_v28 = vpop.eup %295 }
 0x1aa   :  { %v172_v29 = vsel %vm165_vm4, %v296_v28, 0.0 }
 0x1ab   :  { %173 = vadd.xlane.f32.xlu1 %v172_v29 }
 0x21e   :  { %v174_v30 = vpop.xlane.xlu1 %173 }
 0x21f   :  { %297 = vrcp.f32 %v174_v30  ;;  %v186_v34 = vand.u32 2147483648, %v174_v30  ;;  %v184_v36 = vand.u32 2147483647, %v174_v30  ;;  %vm180_vm6 = vweird.f32 %v174_v30 }
 0x221   :  { %v187_v38 = vor.u32 1.1754944e-38, %v186_v34  ;;  %vm185_vm8 = vcmp.eq.f32.partialorder %v184_v36, 8.507059e+37 }
 0x225   :  { %v298_v31 = vpop.eup %297 }
 0x226   :  { %v176_v32 = vmul.f32 %v298_v31, %v174_v30  ;;  %vm181_vm5 = vweird.f32 %v298_v31 }
 0x227   :  { %vm182_vm7 = vmor %vm180_vm6, %vm181_vm5 }
 0x228   :  { %v177_v33 = vsub.f32 1.0, %v176_v32 }
 0x22a   :  { %v178_v35 = vmul.f32 %v298_v31, %v177_v33 }
 0x22c   :  { %v179_v37 = vadd.f32 %v298_v31, %v178_v35 }
 0x22e   :  { %v183_v39 = vsel %vm182_vm7, %v298_v31, %v179_v37 }
 0x22f   :  { %v188_v40 = vsel %vm185_vm8, %v187_v38, %v183_v39 }
 0x230   :  { %v189_v41 = vmul.f32 %v296_v28, %v188_v40 }
 0x232   :  { %190 = vst.msk [vmem:[#allocation10] sm:$0x3] %vm165_vm4, %v189_v41 }
 0x233   :  { %266 = dma.vmem_to_hbm [thread:$0]  %s262_s4, 32, %s264_s14, [#allocation11]  }
 0x239   :  { %v192_v42 = vld [vmem:[#allocation10] sm:$0x1]  ;;  %v220_v43 = vld [vmem:[#allocation10 + $0x1] sm:$0x1] }
 0x23a   :  { %284 = vmatmul.msk.f32.vlgmr.msra.gmra.mxu3 %vm193_vm9, %v192_v42 }
 0x242   :  { %285 = vmatmul.msk.f32.vlgmr.msrb.gmra.mxu3 %vm193_vm9, %v220_v43 }
 0x2bd   :  { %v214_v44 = vpop.f32.mrf.mxu3 }
 0x2be   :  { %218 = vst.msk [vmem:[#allocation9] sm:$0x1] %vm217_vm10, %v214_v44 }
 0x2c5   :  { %v241_v45 = vpop.f32.mrf.mxu3 }
 0x2c6   :  { %244 = vst.msk [vmem:[#allocation9 + $0x1] sm:$0x1] %vm217_vm10, %v241_v45 }
 0x2c7   :  { %255 = dma.vmem_to_hbm [thread:$0]  %s251_s16, 32, %s253_s19, [#allocation6]  }
 0x2c8   :  { %399 = dma.done.wait [#allocation6], 32  }
 0x2c9   :  { %400 = vsyncadd [#allocation6], 4294967264 }
 0x2ca   :  { %401 = dma.done.wait [#allocation11], 32  }
 0x2cb   :  { %402 = vsyncadd [#allocation11], 4294967264 }
 0x2cc   :  { %275 = vsyncpa [#allocation5], 1 }
 0x2cd   :  { %276 = vsyncpa [#allocation8], 1 }
 0x2ce   :  { %277 = vsyncpa [#allocation6], 1 }
 0x2cf   :  { %278 = vsyncpa [#allocation11], 1 }

</bundles_post_ra>
